<compile_context>
chip_gen: v5e
topology: v5e:2x2
jax: 0.10.0
libtpu: 0.0.40
codegen_flags: <defaults>
</compile_context>

<pallas_src>
from collections import OrderedDict

import numpy as np
import jax
import jax.numpy as jnp
from jax import lax
from jax.experimental import pallas as pl
from jax.experimental.pallas import tpu as pltpu

B_PREFIX, I_PREFIX, O_PREFIX = "B", "I", "O"

NEG = -1e9  # finite "minus infinity" for padded tags (avoids inf-inf NaNs)


def _round_up(x, m):
    return ((x + m - 1) // m) * m


# ----------------------------------------------------------------------------
# Host-side label bookkeeping (straight port of the PyTorch helpers, no torch)
# ----------------------------------------------------------------------------
def label_map(num_tags):
    n_pos = num_tags - 1
    span_to_seq = OrderedDict()
    seq_to_span = OrderedDict()
    for i in range(num_tags):
        if i == 0:
            span_to_seq[i] = (0, 0)
            seq_to_span[0] = (O_PREFIX, 0)
        else:
            B, I = i, i + n_pos
            span_to_seq[i] = (B, I)
            seq_to_span[B] = (B_PREFIX, B)
            seq_to_span[I] = (I_PREFIX, B)
    return span_to_seq, seq_to_span


def BIO_to_span(labels, seq_tag_map):
    spans = []
    start = end = -1
    active_tag = None
    if not any(labels):
        return []
    for i, lab in enumerate(labels):
        prefix, tag = seq_tag_map[int(lab)]
        if prefix == O_PREFIX:
            if active_tag is not None:
                spans.append((active_tag, start, end))
            active_tag = None
        elif prefix == B_PREFIX:
            if active_tag is not None:
                spans.append((active_tag, start, end))
            active_tag = tag
            start, end = i, i + 1
        elif prefix == I_PREFIX and tag == active_tag:
            end += 1
        else:  # I with mismatched tag
            if active_tag is not None:
                spans.append((active_tag, start, end))
            active_tag = None
    if active_tag is not None:
        spans.append((active_tag, start, end))
    return spans


def seq_tags_to_spans(seq_tags, span_map, seq_tag_map):
    batch_size = len(seq_tags)
    num_spans = len(span_map)
    span_labels = np.zeros((batch_size, num_spans), dtype=np.int64)
    for i_seq, seq in enumerate(seq_tags):
        for lab, start, end in BIO_to_span(seq, seq_tag_map):
            idx = (start, end)
            if idx in span_map:
                span_labels[i_seq, span_map[idx]] = lab
    return span_labels


# ----------------------------------------------------------------------------
# Kernel 1: Linear projection  (x @ W + b), tiled over rows, lane-dense output
# ----------------------------------------------------------------------------
def _projection_kernel(x_ref, w_ref, b_ref, o_ref):
    o_ref[...] = (
        jnp.dot(x_ref[...], w_ref[...], preferred_element_type=jnp.float32)
        + b_ref[...]
    )


def projection(seq_tensor, w_pad_bf16, b_pad):
    """(B, T, D) f32 -> (M_pad, K_pad) f32 scores (rows/tags zero-padded)."""
    Bsz, T, D = seq_tensor.shape
    KP = w_pad_bf16.shape[1]
    M = Bsz * T

    # Row-tile budget: keep double-buffered x (bf16) + out (f32) blocks well
    # under the 32 MiB scoped-VMEM default (and v7x's 64 MiB physical VMEM).
    bytes_per_row = 2 * D * 2 + 2 * KP * 4
    TM = max(8, min(512, (16 * 1024 * 1024 // bytes_per_row) // 8 * 8))
    TM = min(TM, _round_up(M, 8))
    M_pad = _round_up(M, TM)

    x = seq_tensor.reshape(M, D).astype(jnp.bfloat16)
    if M_pad != M:
        x = jnp.pad(x, ((0, M_pad - M), (0, 0)))

    return pl.pallas_call(
        _projection_kernel,
        grid=(M_pad // TM,),
        in_specs=[
            pl.BlockSpec((TM, D), lambda i: (i, 0)),   # activation rows (tiled)
            pl.BlockSpec((D, KP), lambda i: (0, 0)),   # weights (resident)
            pl.BlockSpec((1, KP), lambda i: (0, 0)),   # bias
        ],
        out_specs=pl.BlockSpec((TM, KP), lambda i: (i, 0)),
        out_shape=jax.ShapeDtypeStruct((M_pad, KP), jnp.float32),
        compiler_params=pltpu.CompilerParams(
            dimension_semantics=("parallel",)),
    )(x, w_pad_bf16, b_pad)


# ----------------------------------------------------------------------------
# Kernel 2: CRF Viterbi (batched forward max-sum DP + on-device backtrace)
#   alpha_0       = start + logits[0]
#   alpha_t[cur]  = max_prev(alpha_{t-1}[prev] + transitions[prev, cur]) + logits[t, cur]
#   final         = alpha_{len-1} + end
#   tags[len-1]   = argmax(final);  tags[t-1] = bp[t, tags[t]]
# ----------------------------------------------------------------------------
def _viterbi_kernel(lens_smem, lens_ref, logits_ref, transT_ref, start_ref,
                    end_ref, tags_ref, bp_ref):
    T, Bb, KV = logits_ref.shape

    # Dynamic trip count: max sequence length in this batch block (SMEM scalars).
    base = pl.program_id(0) * Bb
    lmax = lens_smem[base]
    for i in range(1, Bb):
        lmax = jnp.maximum(lmax, lens_smem[base + i])

    lens = lens_ref[...]                     # (Bb, 1) int32 per-row lengths
    trans = transT_ref[...]                  # (KV, KV); trans[cur, prev]
    prev_iota = lax.broadcasted_iota(jnp.int32, (Bb, KV, KV), 2)
    kv_iota = lax.broadcasted_iota(jnp.int32, (Bb, KV), 1)
    col_iota = lax.broadcasted_iota(jnp.int32, (Bb, T), 1)

    bp_ref[0] = jnp.zeros((Bb, KV), jnp.int32)
    alpha0 = start_ref[...] + logits_ref[0]                 # (Bb, KV)

    def dp_body(t, alpha):
        # scores[b, cur, prev] = alpha[b, prev] + transitions[prev, cur]
        scores = alpha[:, None, :] + trans[None, :, :]      # (Bb, KV, KV)
        best = jnp.max(scores, axis=-1)                     # (Bb, KV)
        # first-index argmax expressed as compare + min (guaranteed lowering)
        best_prev = jnp.min(
            jnp.where(scores == best[..., None], prev_iota, KV), axis=-1
        ).astype(jnp.int32)                                 # (Bb, KV)
        bp_ref[t] = best_prev                               # one tile, no RMW
        new_alpha = best + logits_ref[t]
        # rows whose sequence already ended keep their alpha frozen
        return jnp.where(t < lens, new_alpha, alpha)

    alpha = lax.fori_loop(1, lmax, dp_body, alpha0)

    final = alpha + end_ref[...]                            # (Bb, KV)
    fbest = jnp.max(final, axis=-1, keepdims=True)          # (Bb, 1)
    last_tag = jnp.min(
        jnp.where(final == fbest, kv_iota, KV), axis=-1, keepdims=True
    ).astype(jnp.int32)                                     # (Bb, 1)

    def bt_body(i, carry):
        cur, tags = carry                                   # (Bb,1), (Bb,T)
        t = lmax - 1 - i
        cur = jnp.where(t == lens - 1, last_tag, cur)       # seed at last pos
        tags = jnp.where(col_iota == t,
                         jnp.where(t < lens, cur, 0), tags)
        bp_t = bp_ref[t]                                    # (Bb, KV)
        nxt = jnp.sum(jnp.where(kv_iota == cur, bp_t, 0),
                      axis=-1, keepdims=True).astype(jnp.int32)
        return nxt, tags

    carry0 = (jnp.zeros((Bb, 1), jnp.int32), jnp.zeros((Bb, T), jnp.int32))
    _, tags = lax.fori_loop(0, lmax, bt_body, carry0)
    tags_ref[...] = tags                                    # single store


def viterbi_decode(logits_pad, lengths, transitions, start_trans, end_trans,
                   num_tags_seq, block_b=8):
    """logits_pad: (B, T, K_pad) f32 (zero columns beyond K). Returns (B, T)
    int32 decoded tag ids (zeros beyond each sequence length)."""
    Bsz, T, KP = logits_pad.shape
    K = num_tags_seq
    KV = max(8, _round_up(K, 8))            # small sublane-aligned tag padding

    # Padded tags: emissions are 0 (zero weight columns); transitions / start /
    # end get a large negative so the DP can never select a phantom tag.
    transT = jnp.full((KV, KV), NEG, jnp.float32)
    transT = transT.at[:K, :K].set(jnp.transpose(transitions))   # [cur, prev]
    start = jnp.full((1, KV), NEG, jnp.float32).at[0, :K].set(start_trans)
    end = jnp.full((1, KV), NEG, jnp.float32).at[0, :K].set(end_trans)

    Bb = block_b
    B_pad = _round_up(max(Bsz, Bb), Bb)
    logits_v = logits_pad[:, :, :KV]
    logits_v = jnp.pad(logits_v, ((0, B_pad - Bsz), (0, 0), (0, 0)))
    logits_v = jnp.transpose(logits_v, (1, 0, 2))        # time-major (T, B, KV)

    lens = jnp.pad(lengths.astype(jnp.int32), (0, B_pad - Bsz))
    lens2d = lens.reshape(B_pad, 1)

    grid_spec = pltpu.PrefetchScalarGridSpec(
        num_scalar_prefetch=1,                           # lengths -> SMEM
        grid=(B_pad // Bb,),
        in_specs=[
            pl.BlockSpec((Bb, 1), lambda g, L: (g, 0)),          # lengths (vec)
            pl.BlockSpec((T, Bb, KV), lambda g, L: (0, g, 0)),   # logits
            pl.BlockSpec((KV, KV), lambda g, L: (0, 0)),         # transitions^T
            pl.BlockSpec((1, KV), lambda g, L: (0, 0)),          # start
            pl.BlockSpec((1, KV), lambda g, L: (0, 0)),          # end
        ],
        out_specs=pl.BlockSpec((Bb, T), lambda g, L: (g, 0)),    # decoded tags
        scratch_shapes=[pltpu.VMEM((T, Bb, KV), jnp.int32)],     # backpointers
    )
    tags = pl.pallas_call(
        _viterbi_kernel,
        grid_spec=grid_spec,
        out_shape=jax.ShapeDtypeStruct((B_pad, T), jnp.int32),
        compiler_params=pltpu.CompilerParams(
            dimension_semantics=("parallel",)),
    )(lens, lens2d, logits_v, transT, start, end)
    return tags[:Bsz]


# ----------------------------------------------------------------------------
# SpanScorerCRF (forward only), parameters initialized deterministically
# ----------------------------------------------------------------------------
class SpanScorerCRFPallas:
    def __init__(self, input_dim, num_tags, key):
        self.input_dim = input_dim
        self.num_tags = num_tags
        self.span_to_seq, self.seq_to_span = label_map(num_tags)
        self.num_tags_seq = len(self.seq_to_span)    # 2 * num_tags - 1
        self.num_tags_span = len(self.span_to_seq)   # num_tags
        K = self.num_tags_seq
        self.k_pad = max(128, _round_up(K, 128))     # lane-dense projection width

        k1, k2, k3, k4, k5 = jax.random.split(key, 5)
        self.w = 0.1 * jax.random.normal(k1, (input_dim, K), jnp.float32)
        self.b = 0.1 * jax.random.normal(k2, (K,), jnp.float32)
        self.transitions = jax.random.normal(k3, (K, K), jnp.float32)
        self.start_trans = jax.random.normal(k4, (K,), jnp.float32)
        self.end_trans = jax.random.normal(k5, (K,), jnp.float32)

        # Zero-padded (lane-dense) projection parameters; weights kept in bf16.
        w_pad = jnp.zeros((input_dim, self.k_pad), jnp.float32)
        w_pad = w_pad.at[:, :K].set(self.w)
        self.w_pad = w_pad.astype(jnp.bfloat16)
        self.b_pad = jnp.zeros((1, self.k_pad), jnp.float32).at[0, :K].set(self.b)

    def forward(self, seq_tensor, seq_mask, span_map, span_indices=None):
        Bsz, T, D = seq_tensor.shape
        K = self.num_tags_seq

        # 1) projection (tiled Pallas matmul, bf16 in / f32 accumulate,
        #    128-lane-padded output for unmasked stores)
        scores_pad = projection(seq_tensor, self.w_pad, self.b_pad)
        seq_scores = scores_pad[:Bsz * T, :K].reshape(Bsz, T, K)
        logits_pad = scores_pad[:Bsz * T].reshape(Bsz, T, self.k_pad)

        # 2) CRF Viterbi decode: fused DP + backtrace on device; only the
        #    (B, T) tag sequences are transferred to the host.
        lengths = jnp.sum(seq_mask.astype(jnp.int32), axis=1)
        tags = viterbi_decode(logits_pad, lengths, self.transitions,
                              self.start_trans, self.end_trans, K)

        # 3) BIO -> span conversion: host-side dict lookups, variable-length
        #    sequences — no clean Pallas equivalent.
        # TODO(synk): span aggregation could be vectorized on device if the
        # span_map were a dense (num_spans, 2) array instead of a Python dict.
        tags_np = np.asarray(jax.device_get(tags))
        len_np = np.asarray(jax.device_get(lengths))
        seq_pred = [
            [int(t) for t in tags_np[i, :int(len_np[i])]] for i in range(Bsz)
        ]
        span_labels = seq_tags_to_spans(seq_pred, span_map, self.seq_to_span)
        span_pred = jax.nn.one_hot(jnp.asarray(span_labels),
                                   self.num_tags_span, dtype=jnp.float32)
        return seq_scores, span_pred


# ----------------------------------------------------------------------------
if __name__ == "__main__":
    key = jax.random.PRNGKey(0)
    Bsz, T, D, num_tags = 2, 8, 32, 3
    kx, kp = jax.random.split(key)

    model = SpanScorerCRFPallas(D, num_tags, kp)

    seq_tensor = jax.random.normal(kx, (Bsz, T, D), jnp.float32)
    lengths = np.array([8, 6])
    seq_mask = jnp.asarray(np.arange(T)[None, :] < lengths[:, None])

    # span_map: all spans of width <= 4 within the sequence
    span_map = OrderedDict()
    for s in range(T):
        for e in range(s + 1, min(s + 4, T) + 1):
            span_map[(s, e)] = len(span_map)

    seq_scores, span_pred = model.forward(seq_tensor, seq_mask, span_map, None)
    jax.block_until_ready(seq_scores)
    jax.block_until_ready(span_pred)

    assert seq_scores.shape == (Bsz, T, model.num_tags_seq)
    assert seq_scores.dtype == jnp.float32
    assert span_pred.shape == (Bsz, len(span_map), model.num_tags_span)
    assert span_pred.dtype == jnp.float32

    print("KERNEL_OK")
</pallas_src>

<mosaic_0001>
module attributes {stable_mosaic.version = 11 : i64} {
  func.func @_projection_kernel(%arg0: i32, %arg1: memref<16x32xbf16, #tpu.memory_space<vmem>>, %arg2: memref<32x128xbf16, #tpu.memory_space<vmem>>, %arg3: memref<1x128xf32, #tpu.memory_space<vmem>>, %arg4: memref<16x128xf32, #tpu.memory_space<vmem>>) attributes {dimension_semantics = [#tpu.dimension_semantics<parallel>], iteration_bounds = array<i64: 1>, scalar_prefetch = 0 : i64, scratch_operands = 0 : i64, tpu.core_type = #tpu.core_type<tc>, window_params = [{transform_indices = @transform_0, window_bounds = array<i64: 16, 32>}, {pipeline_mode = #tpu.pipeline_mode<synchronous>, transform_indices = @transform_1, window_bounds = array<i64: 32, 128>}, {pipeline_mode = #tpu.pipeline_mode<synchronous>, transform_indices = @transform_2, window_bounds = array<i64: 1, 128>}, {transform_indices = @transform_3, window_bounds = array<i64: 16, 128>}]} {
    %c0 = arith.constant 0 : index
    %c0_0 = arith.constant 0 : index
    %0 = vector.load %arg1[%c0, %c0_0] : memref<16x32xbf16, #tpu.memory_space<vmem>>, vector<16x32xbf16>
    %c0_1 = arith.constant 0 : index
    %c0_2 = arith.constant 0 : index
    %1 = vector.load %arg2[%c0_1, %c0_2] : memref<32x128xbf16, #tpu.memory_space<vmem>>, vector<32x128xbf16>
    %cst = arith.constant dense<0.000000e+00> : vector<16x128xf32>
    %2 = tpu.matmul %0, %1, %cst {dimension_numbers = #tpu.dot_dimension_numbers<[1], [0], [0], [1], [0, 0, 1, 1], [], []>} : vector<16x32xbf16>, vector<32x128xbf16>, vector<16x128xf32> -> vector<16x128xf32>
    %c0_3 = arith.constant 0 : index
    %c0_4 = arith.constant 0 : index
    %3 = vector.load %arg3[%c0_3, %c0_4] : memref<1x128xf32, #tpu.memory_space<vmem>>, vector<1x128xf32>
    %4 = vector.broadcast %3 : vector<1x128xf32> to vector<16x128xf32>
    %5 = arith.addf %2, %4 : vector<16x128xf32>
    %c0_5 = arith.constant 0 : index
    %c0_6 = arith.constant 0 : index
    %6 = vector.load %arg4[%c0_5, %c0_6] : memref<16x128xf32, #tpu.memory_space<vmem>>, vector<16x128xf32>
    tpu.vector_store %arg4[%c0_5, %c0_6], %5 {strides = array<i32>} : memref<16x128xf32, #tpu.memory_space<vmem>>, vector<16x128xf32>,
    return
  }
  func.func @transform_0(%arg0: i32) -> (i32, i32) {
    %c0_i32 = arith.constant 0 : i32
    %c0_i32_0 = arith.constant 0 : i32
    return %arg0, %c0_i32 : i32, i32
  }
  func.func @transform_1(%arg0: i32) -> (i32, i32) {
    %c0_i32 = arith.constant 0 : i32
    %c0_i32_0 = arith.constant 0 : i32
    %c0_i32_1 = arith.constant 0 : i32
    return %c0_i32, %c0_i32_0 : i32, i32
  }
  func.func @transform_2(%arg0: i32) -> (i32, i32) {
    %c0_i32 = arith.constant 0 : i32
    %c0_i32_0 = arith.constant 0 : i32
    %c0_i32_1 = arith.constant 0 : i32
    return %c0_i32, %c0_i32_0 : i32, i32
  }
  func.func @transform_3(%arg0: i32) -> (i32, i32) {
    %c0_i32 = arith.constant 0 : i32
    %c0_i32_0 = arith.constant 0 : i32
    return %arg0, %c0_i32 : i32, i32
  }
}

</mosaic_0001>

<bundles_post_ra>
// kernel: tpu_custom_call.1
= control target key start
LH: loop header
LB: loop body
LE: loop exit
PB: predicated region body
PF: predicated region fallthrough
CT: control target
= control target key end

     0   :  { %8 = vsyncpa [#allocation3], 0  ;;  %s256_s0 = inlined_call_operand.hbm [shape: bf16[16,32], index: 0, kind: input, shape index: {}]   ;;  %s257_s1 = inlined_call_operand.hbm [shape: bf16[32,128], index: 1, kind: input, shape index: {}]   ;;  %s258_s2 = inlined_call_operand.vmem [shape: f32[1,128], index: 2, kind: input, shape index: {}]   ;;  %s259_s3 = inlined_call_operand.hbm [shape: f32[16,128], index: 3, kind: output, shape index: {}]  }
   0x1   :  { %9 = vsyncpa [#allocation6], 0 }
   0x2   :  { %10 = vsyncpa [#allocation4], 0  ;;  %s15_s14 = sshll.u32 %s256_s0, 4  ;;  %s217_s15 = smov [#allocation2]   ;;  %s16_s14 = int_to_ptr.hbm [resolvable:$true] %s15_s14 }
   0x3   :  { %s17_s16 = sshll.u32 %s217_s15, 4  ;;  %s28_s19 = sshll.u32 %s257_s1, 4  ;;  %s18_s16 = int_to_ptr.vmem [resolvable:$true] %s17_s16  ;;  %s29_s19 = int_to_ptr.hbm [resolvable:$true] %s28_s19 }
   0x4   :  { %s218_s20 = smov 64   ;;  %s219_s21 = smov 4  }
   0x5   :  { %23 = dma.hbm_to_vmem [thread:$0]  %s16_s14, 128, %s18_s16, [#allocation3], %s218_s20, %s218_s20, %s219_s21  }
   0x6   :  { %s220_s22 = smov [#allocation5]  }
   0x7   :  { %s30_s23 = sshll.u32 %s220_s22, 4  ;;  %s31_s23 = int_to_ptr.vmem [resolvable:$true] %s30_s23 }
   0x8   :  { %36 = dma.hbm_to_vmem [thread:$0]  %s29_s19, 256, %s31_s23, [#allocation6], %s218_s20, %s218_s20, %s219_s21  }
   0x9   :  { %211 = dma.done.wait [#allocation3], 128  }
   0xa   :  { %212 = vsyncadd [#allocation3], 4294967168 }
   0xb   :  { %213 = dma.done.wait [#allocation6], 256  }
   0xc   :  { %214 = vsyncadd [#allocation6], 4294967040  ;;  %v130_v0 = vld [vmem:[#allocation5 + $0x8] sm:$0xff]  ;;  %v129_v1 = vld [vmem:[#allocation5] sm:$0xff]  ;;  %vm75_vm0 = vcmask 261120   ;;  %s221_s24 = smov [#allocation7]  }
   0xd   :  { %85 = vmatpush.bf16.msra.mxu0 %v130_v0  ;;  %v128_v2 = vld [vmem:[#allocation2] sm:$0xff]  ;;  %s99_s25 = sshll.u32 %s221_s24, 4  ;;  %s101_s28 = sshll.u32 %s259_s3, 4  ;;  %s100_s25 = int_to_ptr.vmem [resolvable:$true] %s99_s25  ;;  %s102_s28 = int_to_ptr.hbm [resolvable:$true] %s101_s28 }
   0xe   :  { %v138_v3 = vld [vmem:[%s258_s2] ss:$0 sm:$0xff]  ;;  %s222_s29 = smov 128   ;;  %s223_s30 = smov 8  }
  0x11   :  { %86 = vmatpush.bf16.msra.mxu0 %v129_v1 }
  0x14   :  { %127 = vmatmul.msk.bf16.vlgmr.msra.gmra.mxu0 %vm75_vm0, %v128_v2 }
  0x91   :  { %v88_v4 = vpop.f32.mrf.mxu0 }
  0x92   :  { %v89_v5 = vadd.f32 %v138_v3, %v88_v4 }
  0x94   :  { %93 = vst [vmem:[#allocation7] sm:$0xff] %v89_v5 }
  0x99   :  { %v90_v6 = vpop.f32.mrf.mxu0 }
  0x9a   :  { %v91_v7 = vadd.f32 %v138_v3, %v90_v6 }
  0x9c   :  { %94 = vst [vmem:[#allocation7 + $0x8] sm:$0xff] %v91_v7 }
  0x9d   :  { %107 = dma.vmem_to_hbm [thread:$0]  %s100_s25, 256, %s102_s28, [#allocation4], %s222_s29, %s222_s29, %s223_s30  }
  0x9e   :  { %215 = dma.done.wait [#allocation4], 256  }
  0x9f   :  { %216 = vsyncadd [#allocation4], 4294967040 }
  0xa0   :  { %112 = vsyncpa [#allocation3], 1 }
  0xa1   :  { %113 = vsyncpa [#allocation6], 1 }
  0xa2   :  { %114 = vsyncpa [#allocation4], 1 }

</bundles_post_ra>
